<compile_context>
chip_gen: v7x
topology: tpu7x:2x2x1
jax: 0.10.0
libtpu: 0.0.40
codegen_flags: <defaults>
</compile_context>

<pallas_src>
import jax
import jax.numpy as jnp
from jax.experimental import pallas as pl
from jax.experimental.pallas import tpu as pltpu

_VMEM_LIMIT = 32 * 1024 * 1024  # explicit scoped-VMEM budget (safe on v5e/v6e/v7x)


# ----------------------------- small helpers --------------------------------
def _round_up(x, m):
    return (x + m - 1) // m * m


def _pad2d(a, rows, cols):
    r, c = a.shape
    return jnp.pad(a, ((0, rows - r), (0, cols - c)))


def _sigmoid(x):
    # explicit form (exp lowers to the EUP); used identically in kernels & reference
    return 1.0 / (1.0 + jnp.exp(-x))


def _fold_bn(bn, w, b, eps=1e-5):
    """Fold an eval-mode BatchNorm1d (applied before a Linear) into the Linear."""
    s = bn["gamma"] / jnp.sqrt(bn["var"] + eps)
    t = bn["beta"] - bn["mean"] * s
    return s[:, None] * w, t @ w + b


# --------------------------- kernel 1: linear --------------------------------
def _linear_kernel(x_ref, w_ref, b_ref, o_ref):
    o_ref[...] = (jnp.dot(x_ref[...], w_ref[...], preferred_element_type=jnp.float32)
                  + b_ref[...]).astype(o_ref.dtype)


def pallas_linear(x, w, b, tile_m=256, compute_dtype=jnp.float32):
    """y = x @ W + b, row-tiled over M, W/b VMEM-resident, lane-dense N/K."""
    M, K = x.shape
    Kw, N = w.shape
    assert K == Kw
    Kp = _round_up(K, 128)                        # lane-dense contraction
    Np = _round_up(N, 128)                        # lane-dense (unmasked) stores
    row_mult = 16 if compute_dtype == jnp.bfloat16 else 8   # bf16 min tile is (16,128)
    TM = min(_round_up(int(tile_m), row_mult), _round_up(M, row_mult))
    Mp = _round_up(M, TM)

    x_p = _pad2d(x, Mp, Kp).astype(compute_dtype)          # bf16 operands on v6e/v7x
    w_p = _pad2d(w, Kp, Np).astype(compute_dtype)
    b_p = jnp.pad(jnp.reshape(b, (1, N)).astype(jnp.float32), ((0, 0), (0, Np - N)))

    isz = jnp.dtype(compute_dtype).itemsize
    cost = pl.CostEstimate(
        flops=2 * Mp * Kp * Np,
        transcendentals=0,
        bytes_accessed=Mp * Kp * isz + Kp * Np * isz + 4 * Np + 4 * Mp * Np,
    )

    out = pl.pallas_call(
        _linear_kernel,
        out_shape=jax.ShapeDtypeStruct((Mp, Np), jnp.float32),
        grid=(Mp // TM,),
        in_specs=[
            pl.BlockSpec((TM, Kp), lambda i: (i, 0)),      # activations streamed per tile
            pl.BlockSpec((Kp, Np), lambda i: (0, 0)),      # weights resident
            pl.BlockSpec((1, Np), lambda i: (0, 0)),       # bias resident
        ],
        out_specs=pl.BlockSpec((TM, Np), lambda i: (i, 0)),
        compiler_params=pltpu.CompilerParams(
            dimension_semantics=("parallel",),
            vmem_limit_bytes=_VMEM_LIMIT,
        ),
        cost_estimate=cost,
    )(x_p, w_p, b_p)
    return out[:M, :N]


# ------------------ kernel 2: fused bidirectional LSTM ------------------------
def _make_bilstm_kernel(H, t_chunk, compute_dtype):
    def lstm_step(xp, m, h_prev, c_prev, whh):
        gates = xp + jnp.dot(h_prev.astype(compute_dtype), whh,
                             preferred_element_type=jnp.float32)
        # TODO(synk): 64-lane gate slices are not 128-aligned (second-order XLU cost).
        i = _sigmoid(gates[:, 0 * H:1 * H])
        f = _sigmoid(gates[:, 1 * H:2 * H])
        g = jnp.tanh(gates[:, 2 * H:3 * H])
        o = _sigmoid(gates[:, 3 * H:4 * H])
        c_new = f * c_prev + i * g
        h_new = o * jnp.tanh(c_new)
        keep = m > 0.0                                     # (Bp, 1) packed-seq mask
        return (jnp.where(keep, h_new, h_prev),            # freeze state past length
                jnp.where(keep, c_new, c_prev),
                jnp.where(keep, h_new, 0.0))               # pad_packed: zeros past length

    def kernel(xpf_ref, xpb_ref, mf_ref, mb_ref, whhf_ref, whhb_ref,
               hf_out_ref, hb_out_ref, hf, cf, hb, cb):
        @pl.when(pl.program_id(0) == 0)
        def _init():
            for r in (hf, cf, hb, cb):
                r[...] = jnp.zeros_like(r)

        h_f, c_f = hf[...], cf[...]
        h_b, c_b = hb[...], cb[...]
        w_f = whhf_ref[...]
        w_b = whhb_ref[...]
        # Fully unrolled chunk with STATIC in-chunk indices; backward direction runs
        # time-reversed (its chunks also arrive reversed via the index_map).
        # TODO(synk): a direction-'parallel' grid axis (v7x 2-TC split) would need
        # dynamic in-chunk indices; kept static here for guaranteed lowering.
        for s in range(t_chunk):
            sb = t_chunk - 1 - s
            h_f, c_f, o_f = lstm_step(xpf_ref[s], mf_ref[s], h_f, c_f, w_f)
            h_b, c_b, o_b = lstm_step(xpb_ref[sb], mb_ref[sb], h_b, c_b, w_b)
            hf_out_ref[s] = o_f
            hb_out_ref[sb] = o_b
        hf[...] = h_f
        cf[...] = c_f
        hb[...] = h_b
        cb[...] = c_b
    return kernel


def bilstm_recurrence(xp_tm, m_tm, w_hh_f, w_hh_b, H, t_chunk=8,
                      compute_dtype=jnp.float32):
    """xp_tm: (Tp, Bp, 8H) gate pre-activations (fwd lanes [0,4H), bwd [4H,8H));
    m_tm: (Tp, Bp, 1) validity mask.  Returns (h_f, h_b), each (Tp, Bp, H)."""
    Tp, Bp, G = xp_tm.shape
    assert G == 8 * H and Tp % t_chunk == 0
    nC = Tp // t_chunk
    G4 = 4 * H
    w_f = w_hh_f.astype(compute_dtype)
    w_b = w_hh_b.astype(compute_dtype)
    wsz = jnp.dtype(compute_dtype).itemsize

    cost = pl.CostEstimate(
        flops=2 * 2 * Tp * Bp * H * G4,
        transcendentals=2 * 5 * Tp * Bp * H,
        bytes_accessed=(4 * Tp * Bp * G + 2 * 4 * Tp * Bp
                        + 2 * H * G4 * wsz + 2 * 4 * Tp * Bp * H),
    )

    h_f, h_b = pl.pallas_call(
        _make_bilstm_kernel(H, t_chunk, compute_dtype),
        out_shape=(jax.ShapeDtypeStruct((Tp, Bp, H), jnp.float32),
                   jax.ShapeDtypeStruct((Tp, Bp, H), jnp.float32)),
        grid=(nC,),
        in_specs=[
            # forward gate chunk (lanes [0,4H))
            pl.BlockSpec((t_chunk, Bp, G4), lambda c: (c, 0, 0)),
            # backward gate chunk (lanes [4H,8H)), chunk index reversed in time
            pl.BlockSpec((t_chunk, Bp, G4), lambda c: (nC - 1 - c, 0, 1)),
            pl.BlockSpec((t_chunk, Bp, 1), lambda c: (c, 0, 0)),
            pl.BlockSpec((t_chunk, Bp, 1), lambda c: (nC - 1 - c, 0, 0)),
            pl.BlockSpec((H, G4), lambda c: (0, 0)),       # recurrent weights resident
            pl.BlockSpec((H, G4), lambda c: (0, 0)),
        ],
        out_specs=(pl.BlockSpec((t_chunk, Bp, H), lambda c: (c, 0, 0)),
                   pl.BlockSpec((t_chunk, Bp, H), lambda c: (nC - 1 - c, 0, 0))),
        scratch_shapes=[pltpu.VMEM((Bp, H), jnp.float32),  # h_f, c_f, h_b, c_b
                        pltpu.VMEM((Bp, H), jnp.float32),
                        pltpu.VMEM((Bp, H), jnp.float32),
                        pltpu.VMEM((Bp, H), jnp.float32)],
        compiler_params=pltpu.CompilerParams(
            dimension_semantics=("arbitrary",),            # sequential recurrence
            vmem_limit_bytes=_VMEM_LIMIT,
        ),
        cost_estimate=cost,
    )(xp_tm, xp_tm, m_tm, m_tm, w_f, w_b)
    return h_f, h_b


# ---------------- kernel 3: NER linear + masked softmax (fused) ---------------
def _make_ner_kernel(valid_n):
    def kernel(x_ref, bias_ref, w_ref, logit_ref, prob_ref):
        logits = jnp.dot(x_ref[0], w_ref[...], preferred_element_type=jnp.float32)
        logits = logits + bias_ref[0]                      # per-batch-row bias (1, Np)
        logit_ref[0] = logits
        col = jax.lax.broadcasted_iota(jnp.int32, logits.shape, 1)
        masked = jnp.where(col < valid_n, logits, -1e30)   # padded lanes -> prob 0
        m = jnp.max(masked, axis=-1, keepdims=True)
        e = jnp.exp(masked - m)
        denom = jnp.sum(e, axis=-1, keepdims=True)
        prob_ref[0] = e * pl.reciprocal(denom, approx=True)
    return kernel


def pallas_ner_head(X1, va_max, w_ner, b_ner, tile_t=128, compute_dtype=jnp.float32):
    """logits = concat(X1, broadcast(va_max)) @ w_ner + b_ner  (+ softmax), WITHOUT
    materializing the (B, T, 4H) concat: the va_max branch is folded into a tiny
    per-batch-row bias computed once (left to XLA)."""
    B, T, D = X1.shape            # D = 2H
    Dw, N = w_ner.shape           # Dw = 4H
    assert Dw == 2 * D
    row_bias = va_max @ w_ner[D:] + b_ner                  # (B, N), tiny XLA dot

    Dp = _round_up(D, 128)
    Np = _round_up(N, 128)
    row_mult = 16 if compute_dtype == jnp.bfloat16 else 8
    TT = min(int(tile_t), _round_up(T, row_mult))
    TT = _round_up(TT, row_mult)
    Tp = _round_up(T, TT)

    x_p = jnp.pad(X1, ((0, 0), (0, Tp - T), (0, Dp - D))).astype(compute_dtype)
    bias_p = jnp.pad(row_bias.astype(jnp.float32), ((0, 0), (0, Np - N)))[:, None, :]
    w_seq = jnp.pad(w_ner[:D], ((0, Dp - D), (0, Np - N))).astype(compute_dtype)

    isz = jnp.dtype(compute_dtype).itemsize
    cost = pl.CostEstimate(
        flops=2 * B * Tp * Dp * Np,
        transcendentals=B * Tp * Np,
        bytes_accessed=(B * Tp * Dp * isz + Dp * Np * isz + 4 * B * Np
                        + 2 * 4 * B * Tp * Np),
    )

    logits_p, probs_p = pl.pallas_call(
        _make_ner_kernel(N),
        out_shape=(jax.ShapeDtypeStruct((B, Tp, Np), jnp.float32),
                   jax.ShapeDtypeStruct((B, Tp, Np), jnp.float32)),
        grid=(B, Tp // TT),
        in_specs=[
            pl.BlockSpec((1, TT, Dp), lambda b, t: (b, t, 0)),
            pl.BlockSpec((1, 1, Np), lambda b, t: (b, 0, 0)),   # per-row bias
            pl.BlockSpec((Dp, Np), lambda b, t: (0, 0)),        # weights resident
        ],
        out_specs=(pl.BlockSpec((1, TT, Np), lambda b, t: (b, t, 0)),
                   pl.BlockSpec((1, TT, Np), lambda b, t: (b, t, 0))),
        compiler_params=pltpu.CompilerParams(
            dimension_semantics=("parallel", "parallel"),
            vmem_limit_bytes=_VMEM_LIMIT,
        ),
        cost_estimate=cost,
    )(x_p, bias_p, w_seq)
    return logits_p[:, :T, :N], probs_p[:, :T, :N]


# --------------- kernel 4: fused pooled sigmoid-MLP heads (BN folded) ---------
def _mlp_head_kernel(v_ref, nf_ref, w1_ref, b1_ref, w2a_ref, w2b_ref, b2_ref, o_ref):
    h = _sigmoid(jnp.dot(v_ref[...], w1_ref[...], preferred_element_type=jnp.float32)
                 + b1_ref[...])
    # padded lanes of h equal sigmoid(0)=0.5 but hit zero rows of w2a -> contribute 0
    y = (jnp.dot(h, w2a_ref[...], preferred_element_type=jnp.float32)
         + jnp.dot(nf_ref[...], w2b_ref[...], preferred_element_type=jnp.float32)
         + b2_ref[...])
    o_ref[...] = _sigmoid(y)


def pallas_mlp_head(v, num_feats, w1, b1, w2, b2):
    """Fused  sigmoid(concat(sigmoid(v@W1+b1), num_feats) @ W2 + b2)  in one call.
    Kept in f32: these are sub-vreg-sized matmuls (launch-overhead bound)."""
    B, D1 = v.shape               # 4H
    _, Hm = w1.shape              # 64
    Dn = num_feats.shape[1]
    D2, N = w2.shape              # 64 + nf, 50
    assert D2 == Hm + Dn
    Bp = _round_up(B, 8)
    D1p = _round_up(D1, 128)
    Hmp = _round_up(Hm, 128)
    Dnp = _round_up(Dn, 128)
    Np = _round_up(N, 128)

    v_p = _pad2d(v.astype(jnp.float32), Bp, D1p)
    nf_p = _pad2d(num_feats.astype(jnp.float32), Bp, Dnp)
    w1_p = _pad2d(w1, D1p, Hmp)
    b1_p = jnp.pad(jnp.reshape(b1, (1, Hm)), ((0, 0), (0, Hmp - Hm)))
    w2a_p = _pad2d(w2[:Hm], Hmp, Np)
    w2b_p = _pad2d(w2[Hm:], Dnp, Np)
    b2_p = jnp.pad(jnp.reshape(b2, (1, N)), ((0, 0), (0, Np - N)))

    out = pl.pallas_call(
        _mlp_head_kernel,
        out_shape=jax.ShapeDtypeStruct((Bp, Np), jnp.float32),
        grid=(1,),
        in_specs=[
            pl.BlockSpec((Bp, D1p), lambda i: (0, 0)),
            pl.BlockSpec((Bp, Dnp), lambda i: (0, 0)),
            pl.BlockSpec((D1p, Hmp), lambda i: (0, 0)),
            pl.BlockSpec((1, Hmp), lambda i: (0, 0)),
            pl.BlockSpec((Hmp, Np), lambda i: (0, 0)),
            pl.BlockSpec((Dnp, Np), lambda i: (0, 0)),
            pl.BlockSpec((1, Np), lambda i: (0, 0)),
        ],
        out_specs=pl.BlockSpec((Bp, Np), lambda i: (0, 0)),
        compiler_params=pltpu.CompilerParams(
            dimension_semantics=("arbitrary",),
            vmem_limit_bytes=_VMEM_LIMIT,
        ),
    )(v_p, nf_p, w1_p, b1_p, w2a_p, w2b_p, b2_p)
    return out[:B, :N]


# ------------------------------ full forward ---------------------------------
def spo_ner_forward(params, X_ids, pos_ids, mask, lengths, num_feats,
                    compute_dtype=jnp.float32, t_chunk=8):
    """Mirrors SPONerModel.forward (eval mode). Returns (logits, class_probs, v)."""
    del lengths  # packing / length sort are emulated exactly via `mask`
    p = params
    B, T = X_ids.shape
    H = p["w_hh_f"].shape[0]
    mask_f = mask.astype(jnp.float32)

    # embeddings (+ concat) ----------------------------------------------------
    # TODO(synk): embedding gathers are left to XLA (irregular access; a Pallas
    # DMA-gather is not worthwhile at this size).
    x = jnp.concatenate([p["word_emb"][X_ids], p["pos_emb"][pos_ids]], axis=-1)
    E = x.shape[-1]

    Bp = _round_up(B, 8)                                   # sublane pad
    Tp = _round_up(T, t_chunk)                             # time pad (masked out)

    # go time-major BEFORE the projection: transpose the narrow E-wide tensor once
    x_tm = jnp.pad(jnp.transpose(x, (1, 0, 2)), ((0, Tp - T), (0, Bp - B), (0, 0)))
    m_tm = jnp.pad(jnp.transpose(mask_f, (1, 0)),
                   ((0, Tp - T), (0, Bp - B)))[..., None]  # (Tp, Bp, 1)

    # fused input projection for both directions -------------------------------
    w_cat = jnp.concatenate([p["w_ih_f"], p["w_ih_b"]], axis=1)          # (E, 8H)
    b_cat = jnp.concatenate([p["b_ih_f"] + p["b_hh_f"],
                             p["b_ih_b"] + p["b_hh_b"]])                 # (8H,)
    xp_tm = pallas_linear(x_tm.reshape(Tp * Bp, E), w_cat, b_cat,
                          compute_dtype=compute_dtype).reshape(Tp, Bp, 8 * H)

    # fused bidirectional LSTM recurrence (time-chunked, no host reversals) ----
    h_f_tm, h_b_tm = bilstm_recurrence(xp_tm, m_tm, p["w_hh_f"], p["w_hh_b"], H,
                                       t_chunk=t_chunk, compute_dtype=compute_dtype)
    X1 = jnp.transpose(jnp.concatenate([h_f_tm, h_b_tm], axis=-1)[:T, :B],
                       (1, 0, 2))                                        # (B, T, 2H)

    # pooled statistics ---------------------------------------------------------
    va_max = jnp.max(X1, axis=1)                                         # (B, 2H)
    va_avg = jnp.sum(X1, axis=1) / jnp.sum(mask_f)                       # torch semantics

    # NER head over every token (no X2 materialization) -------------------------
    logits, probs = pallas_ner_head(X1, va_max, p["w_ner"], p["b_ner"],
                                    compute_dtype=compute_dtype)

    # pooled sentence head: two sigmoid MLPs fused into one kernel --------------
    w1, b1 = _fold_bn(p["bn1"], p["w_mlp"], p["b_mlp"])
    w2, b2 = _fold_bn(p["bn2"], p["w_mlp2"], p["b_mlp2"])
    v = jnp.concatenate([va_avg, va_max], axis=-1)                       # (B, 4H)
    v = pallas_mlp_head(v, num_feats, w1, b1, w2, b2)
    return logits, probs, v


# ------------------------------ pure-JAX reference ---------------------------
def _bn_eval(x, bn, eps=1e-5):
    s = bn["gamma"] / jnp.sqrt(bn["var"] + eps)
    return x * s + (bn["beta"] - bn["mean"] * s)


def reference_forward(params, X_ids, pos_ids, mask, num_feats):
    p = params
    B, T = X_ids.shape
    H = p["w_hh_f"].shape[0]
    mask_f = mask.astype(jnp.float32)
    x = jnp.concatenate([p["word_emb"][X_ids], p["pos_emb"][pos_ids]], axis=-1)

    def run_dir(xseq, mseq, w_ih, w_hh, b_ih, b_hh):
        xp = xseq @ w_ih + (b_ih + b_hh)

        def step(carry, inp):
            h, c = carry
            g_in, m = inp
            g = g_in + h @ w_hh
            i = _sigmoid(g[:, :H]); f = _sigmoid(g[:, H:2 * H])
            gg = jnp.tanh(g[:, 2 * H:3 * H]); o = _sigmoid(g[:, 3 * H:])
            c_new = f * c + i * gg
            h_new = o * jnp.tanh(c_new)
            m = m[:, None]
            return (m * h_new + (1 - m) * h, m * c_new + (1 - m) * c), m * h_new

        init = (jnp.zeros((B, H), jnp.float32), jnp.zeros((B, H), jnp.float32))
        _, hs = jax.lax.scan(step, init, (xp.transpose(1, 0, 2), mseq.T))
        return hs.transpose(1, 0, 2)

    h_f = run_dir(x, mask_f, p["w_ih_f"], p["w_hh_f"], p["b_ih_f"], p["b_hh_f"])
    h_b = run_dir(x[:, ::-1], mask_f[:, ::-1], p["w_ih_b"], p["w_hh_b"],
                  p["b_ih_b"], p["b_hh_b"])[:, ::-1]
    X1 = jnp.concatenate([h_f, h_b], axis=-1)
    va_max = jnp.max(X1, axis=1)
    X2 = jnp.concatenate([X1, jnp.broadcast_to(va_max[:, None, :], X1.shape)], axis=-1)
    logits = X2 @ p["w_ner"] + p["b_ner"]
    probs = jax.nn.softmax(logits, axis=-1)
    va_avg = jnp.sum(X1, axis=1) / jnp.sum(mask_f)
    v = jnp.concatenate([va_avg, va_max], axis=-1)
    v = _sigmoid(_bn_eval(v, p["bn1"]) @ p["w_mlp"] + p["b_mlp"])
    v = jnp.concatenate([v, num_feats], axis=-1)
    v = _sigmoid(_bn_eval(v, p["bn2"]) @ p["w_mlp2"] + p["b_mlp2"])
    return logits, probs, v


# ---------------------------- parameter init ----------------------------------
def init_params(key, vocab, embed, pos_vocab, pos_dim, H, ner_num, nf_dim):
    ks = jax.random.split(key, 20)
    E = embed + pos_dim

    def u(k, shape, scale):
        return jax.random.uniform(k, shape, jnp.float32, -scale, scale)

    p = {}
    we = 0.1 * jax.random.normal(ks[0], (vocab, embed), jnp.float32)
    p["word_emb"] = we.at[0].set(0.0)                       # padding_idx = 0
    pe = 0.1 * jax.random.normal(ks[1], (pos_vocab, pos_dim), jnp.float32)
    p["pos_emb"] = pe.at[0].set(0.0)

    kk = float(H) ** -0.5
    p["w_ih_f"] = u(ks[2], (E, 4 * H), kk); p["w_hh_f"] = u(ks[3], (H, 4 * H), kk)
    p["b_ih_f"] = u(ks[4], (4 * H,), kk);   p["b_hh_f"] = u(ks[5], (4 * H,), kk)
    p["w_ih_b"] = u(ks[6], (E, 4 * H), kk); p["w_hh_b"] = u(ks[7], (H, 4 * H), kk)
    p["b_ih_b"] = u(ks[8], (4 * H,), kk);   p["b_hh_b"] = u(ks[9], (4 * H,), kk)

    k4 = float(4 * H) ** -0.5
    p["w_ner"] = u(ks[10], (4 * H, ner_num), k4); p["b_ner"] = u(ks[11], (ner_num,), k4)
    p["w_mlp"] = u(ks[12], (4 * H, 64), k4);      p["b_mlp"] = u(ks[13], (64,), k4)
    k2 = float(64 + nf_dim) ** -0.5
    p["w_mlp2"] = u(ks[14], (64 + nf_dim, 50), k2); p["b_mlp2"] = u(ks[15], (50,), k2)

    p["bn1"] = dict(gamma=1.0 + 0.1 * jax.random.normal(ks[16], (4 * H,), jnp.float32),
                    beta=0.1 * jax.random.normal(ks[17], (4 * H,), jnp.float32),
                    mean=0.05 * jax.random.normal(ks[18], (4 * H,), jnp.float32),
                    var=jnp.ones((4 * H,), jnp.float32))
    p["bn2"] = dict(gamma=jnp.ones((64 + nf_dim,), jnp.float32),
                    beta=jnp.zeros((64 + nf_dim,), jnp.float32),
                    mean=jnp.zeros((64 + nf_dim,), jnp.float32),
                    var=jnp.ones((64 + nf_dim,), jnp.float32))
    return p


# --------------------------------- main ---------------------------------------
if __name__ == "__main__":
    key = jax.random.PRNGKey(0)
    B, T = 2, 16
    vocab, embed, pos_vocab, pos_dim = 100, 120, 20, 8   # embed + pos_dim = 128 (lane-dense)
    H, ner_num, nf_dim = 64, 50, 4                       # 2H = 128, 4H = 256

    k1, k2, k3, kp = jax.random.split(key, 4)
    lengths = jnp.array([16, 11], dtype=jnp.int32)
    mask_bool = jnp.arange(T)[None, :] < lengths[:, None]
    mask = mask_bool.astype(jnp.float32)                                  # (B, T)
    X_ids = jnp.where(mask_bool, jax.random.randint(k1, (B, T), 1, vocab), 0)
    pos_ids = jnp.where(mask_bool, jax.random.randint(k2, (B, T), 1, pos_vocab), 0)
    num_feats = jax.random.normal(k3, (B, nf_dim), jnp.float32)

    params = init_params(kp, vocab, embed, pos_vocab, pos_dim, H, ner_num, nf_dim)

    r_logits, r_probs, r_v = reference_forward(params, X_ids, pos_ids, mask, num_feats)

    # f32 path (tight check against pure-JAX reference)
    logits, probs, v = spo_ner_forward(params, X_ids, pos_ids, mask, lengths, num_feats)
    logits, probs, v = jax.block_until_ready((logits, probs, v))
    assert logits.shape == (B, T, ner_num)
    assert probs.shape == (B, T, ner_num)
    assert v.shape == (B, 50)
    assert jnp.allclose(logits, r_logits, atol=2e-3, rtol=2e-3)
    assert jnp.allclose(probs, r_probs, atol=2e-3, rtol=2e-3)
    assert jnp.allclose(v, r_v, atol=2e-3, rtol=2e-3)

    # bf16-operand / f32-accumulation path (v6e/v7x MXU recommendation),
    # checked at a looser tolerance per review feedback.
    lb, pb, vb = spo_ner_forward(params, X_ids, pos_ids, mask, lengths, num_feats,
                                 compute_dtype=jnp.bfloat16)
    lb, pb, vb = jax.block_until_ready((lb, pb, vb))
    assert jnp.allclose(lb, r_logits, atol=1e-1, rtol=1e-1)
    assert jnp.allclose(pb, r_probs, atol=5e-2, rtol=5e-2)
    assert jnp.allclose(vb, r_v, atol=5e-2, rtol=5e-2)

    print("KERNEL_OK")
</pallas_src>

<mosaic_0001>
module attributes {stable_mosaic.version = 11 : i64} {
  func.func @_linear_kernel(%arg0: i32, %arg1: memref<128x128xf32, #tpu.memory_space<vmem>>, %arg2: memref<128x512xf32, #tpu.memory_space<vmem>>, %arg3: memref<1x512xf32, #tpu.memory_space<vmem>>, %arg4: memref<128x512xf32, #tpu.memory_space<vmem>>) attributes {dimension_semantics = [#tpu.dimension_semantics<parallel>], iteration_bounds = array<i64: 1>, scalar_prefetch = 0 : i64, scratch_operands = 0 : i64, tpu.core_type = #tpu.core_type<tc>, window_params = [{transform_indices = @transform_0, window_bounds = array<i64: 128, 128>}, {pipeline_mode = #tpu.pipeline_mode<synchronous>, transform_indices = @transform_1, window_bounds = array<i64: 128, 512>}, {pipeline_mode = #tpu.pipeline_mode<synchronous>, transform_indices = @transform_2, window_bounds = array<i64: 1, 512>}, {transform_indices = @transform_3, window_bounds = array<i64: 128, 512>}]} {
    %c0 = arith.constant 0 : index
    %c0_0 = arith.constant 0 : index
    %0 = vector.load %arg1[%c0, %c0_0] : memref<128x128xf32, #tpu.memory_space<vmem>>, vector<128x128xf32>
    %c0_1 = arith.constant 0 : index
    %c0_2 = arith.constant 0 : index
    %1 = vector.load %arg2[%c0_1, %c0_2] : memref<128x512xf32, #tpu.memory_space<vmem>>, vector<128x512xf32>
    %cst = arith.constant dense<0.000000e+00> : vector<128x512xf32>
    %2 = tpu.matmul %0, %1, %cst {dimension_numbers = #tpu.dot_dimension_numbers<[1], [0], [0], [1], [0, 0, 1, 1], [], []>} : vector<128x128xf32>, vector<128x512xf32>, vector<128x512xf32> -> vector<128x512xf32>
    %c0_3 = arith.constant 0 : index
    %c0_4 = arith.constant 0 : index
    %3 = vector.load %arg3[%c0_3, %c0_4] : memref<1x512xf32, #tpu.memory_space<vmem>>, vector<1x512xf32>
    %4 = vector.broadcast %3 : vector<1x512xf32> to vector<128x512xf32>
    %5 = arith.addf %2, %4 : vector<128x512xf32>
    %c0_5 = arith.constant 0 : index
    %c0_6 = arith.constant 0 : index
    %6 = vector.load %arg4[%c0_5, %c0_6] : memref<128x512xf32, #tpu.memory_space<vmem>>, vector<128x512xf32>
    tpu.vector_store %arg4[%c0_5, %c0_6], %5 {strides = array<i32>} : memref<128x512xf32, #tpu.memory_space<vmem>>, vector<128x512xf32>,
    return
  }
  func.func @transform_0(%arg0: i32) -> (i32, i32) {
    %c0_i32 = arith.constant 0 : i32
    %c0_i32_0 = arith.constant 0 : i32
    return %arg0, %c0_i32 : i32, i32
  }
  func.func @transform_1(%arg0: i32) -> (i32, i32) {
    %c0_i32 = arith.constant 0 : i32
    %c0_i32_0 = arith.constant 0 : i32
    %c0_i32_1 = arith.constant 0 : i32
    return %c0_i32, %c0_i32_0 : i32, i32
  }
  func.func @transform_2(%arg0: i32) -> (i32, i32) {
    %c0_i32 = arith.constant 0 : i32
    %c0_i32_0 = arith.constant 0 : i32
    %c0_i32_1 = arith.constant 0 : i32
    return %c0_i32, %c0_i32_0 : i32, i32
  }
  func.func @transform_3(%arg0: i32) -> (i32, i32) {
    %c0_i32 = arith.constant 0 : i32
    %c0_i32_0 = arith.constant 0 : i32
    return %arg0, %c0_i32 : i32, i32
  }
}

</mosaic_0001>

<bundles_post_ra>
// kernel: tpu_custom_call.1
= control target key start
LH: loop header
LB: loop body
LE: loop exit
PB: predicated region body
PF: predicated region fallthrough
CT: control target
= control target key end

     0   :  { %8 = vsyncpa [#allocation3], 0  ;;  %s870_s0 = inlined_call_operand.hbm [shape: f32[128,128], index: 0, kind: input, shape index: {}]   ;;  %s871_s1 = inlined_call_operand.hbm [shape: f32[128,512], index: 1, kind: input, shape index: {}]   ;;  %s872_s2 = inlined_call_operand.vmem [shape: f32[1,512], index: 2, kind: input, shape index: {}]   ;;  %s873_s3 = inlined_call_operand.hbm [shape: f32[128,512], index: 3, kind: output, shape index: {}]  }
   0x1   :  { %9 = vsyncpa [#allocation6], 0 }
   0x2   :  { %10 = vsyncpa [#allocation4], 0  ;;  %s693_s12 = smov [#allocation2]   ;;  %s621_s16 = scalar_lea.hbm %s870_s0, 2048 }
   0x3   :  { %s16_s13 = sshll.u32 %s693_s12, 4  ;;  %p622_p0 = scmp.ne.s32.totalorder %s870_s0, %s621_s16  ;;  %s17_s13 = int_to_ptr.vmem [resolvable:$true] %s16_s13 }
   0x4   :  { %p625_p1 = scmp.lt.u32.totalorder %s621_s16, %s870_s0 }
   0x6   :  { %p627_p2 = pnand %p625_p1, %p622_p0 }
   0x8   :  { %630 = shalt.err (!%p627_p2)
}
   0x9   :  { %s631_s21 = scalar_lea.vmem %s17_s13, 2048  ;;  %p636_p4 = scmp.lt.s32.totalorder %s17_s13, %s17_s13 }
   0xa   :  { %p632_p3 = scmp.ne.s32.totalorder %s17_s13, %s631_s21  ;;  %p637_p5 = scmp.lt.s32.totalorder %s631_s21, %s631_s21 }
   0xc   :  { %p638_p6 = por %p637_p5, %p636_p4 }
   0xe   :  { %p639_p7 = pnand %p638_p6, %p632_p3 }
  0x10   :  { %642 = shalt.err (!%p639_p7)
}
  0x11   :  { %s694_s22 = smov 128   ;;  %s695_s23 = smov 8  }
  0x12   :  { %22 = dma.hbm_to_vmem [thread:$0]  %s870_s0, 2048, %s17_s13, [#allocation3], %s694_s22, %s694_s22, %s695_s23  }
  0x13   :  { %s696_s26 = smov [#allocation5]   ;;  %s643_s30 = scalar_lea.hbm %s871_s1, 8192 }
  0x14   :  { %s28_s27 = sshll.u32 %s696_s26, 4  ;;  %p644_p8 = scmp.ne.s32.totalorder %s871_s1, %s643_s30  ;;  %s29_s27 = int_to_ptr.vmem [resolvable:$true] %s28_s27 }
  0x15   :  { %p647_p9 = scmp.lt.u32.totalorder %s643_s30, %s871_s1 }
  0x17   :  { %p649_p10 = pnand %p647_p9, %p644_p8 }
  0x19   :  { %652 = shalt.err (!%p649_p10)
}
  0x1a   :  { %s653_s8 = scalar_lea.vmem %s29_s27, 8192  ;;  %p658_p12 = scmp.lt.s32.totalorder %s29_s27, %s29_s27 }
  0x1b   :  { %p654_p11 = scmp.ne.s32.totalorder %s29_s27, %s653_s8  ;;  %p659_p13 = scmp.lt.s32.totalorder %s653_s8, %s653_s8 }
  0x1d   :  { %p660_p0 = por %p659_p13, %p658_p12 }
  0x1f   :  { %p661_p1 = pnand %p660_p0, %p654_p11 }
  0x21   :  { %664 = shalt.err (!%p661_p1)
}
  0x22   :  { %s697_s0 = smov 512   ;;  %s698_s9 = smov 32  }
  0x23   :  { %34 = dma.hbm_to_vmem [thread:$0]  %s871_s1, 8192, %s29_s27, [#allocation6], %s697_s0, %s697_s0, %s698_s9  }
  0x24   :  { %687 = dma.done.wait [#allocation3], 2048  }
  0x25   :  { %688 = vsyncadd [#allocation3], 4294965248 }
  0x26   :  { %689 = dma.done.wait [#allocation6], 8192  }
  0x27   :  { %690 = vsyncadd [#allocation6], 4294959104  ;;  %v699_v0 = vmov 0.0   ;;  %v60_v1 = vld [vmem:[#allocation5 + $0x8] sm:$0xff]  ;;  %v62_v3 = vld [vmem:[#allocation5 + $0x18] sm:$0xff] }
  0x28   :  { %209 = vmatprep.mubr.f32.mxu0 %v699_v0  ;;  %370 = vmatprep.mubr.f32.mxu1 %v699_v0  ;;  %v64_v2 = vld [vmem:[#allocation5 + $0x28] sm:$0xff]  ;;  %v66_v5 = vld [vmem:[#allocation5 + $0x38] sm:$0xff]  ;;  %v59_v6 = vld [vmem:[#allocation5] sm:$0xff] }
  0x29   :  { %v549_v4 = vpack.c.bf16 %v64_v2, %v60_v1  ;;  %v63_v7 = vld [vmem:[#allocation5 + $0x20] sm:$0xff]  ;;  %v581_v8 = vpack.c.bf16 %v66_v5, %v62_v3  ;;  %v61_v10 = vld [vmem:[#allocation5 + $0x10] sm:$0xff]  ;;  %v68_v12 = vld [vmem:[#allocation5 + $0x48] sm:$0xff] }
  0x2a   :  { %v551_v9 = vpack.c.bf16 %v63_v7, %v59_v6  ;;  %v65_v11 = vld [vmem:[#allocation5 + $0x30] sm:$0xff]  ;;  %v72_v14 = vld [vmem:[#allocation5 + $0x68] sm:$0xff]  ;;  %v70_v15 = vld [vmem:[#allocation5 + $0x58] sm:$0xff] }
  0x2b   :  { %550 = vmatprep.subr.bf16.mxu0 %v549_v4  ;;  %v583_v13 = vpack.c.bf16 %v65_v11, %v61_v10  ;;  %v74_v16 = vld [vmem:[#allocation5 + $0x78] sm:$0xff]  ;;  %582 = vmatprep.subr.bf16.mxu1 %v581_v8  ;;  %v553_v17 = vpack.c.bf16 %v72_v14, %v68_v12  ;;  %v67_v19 = vld [vmem:[#allocation5 + $0x40] sm:$0xff]  ;;  %v69_v21 = vld [vmem:[#allocation5 + $0x50] sm:$0xff] }
  0x2c   :  { %552 = vmatpush1.bf16.msra.mxu0 %v551_v9  ;;  %v585_v18 = vpack.c.bf16 %v74_v16, %v70_v15  ;;  %v71_v20 = vld [vmem:[#allocation5 + $0x60] sm:$0xff]  ;;  %v73_v23 = vld [vmem:[#allocation5 + $0x70] sm:$0xff]  ;;  %v76_v24 = vld [vmem:[#allocation5 + $0x88] sm:$0xff] }
  0x2d   :  { %584 = vmatpush1.bf16.msra.mxu1 %v583_v13  ;;  %v555_v22 = vpack.c.bf16 %v71_v20, %v67_v19  ;;  %v80_v25 = vld [vmem:[#allocation5 + $0xa8] sm:$0xff]  ;;  %554 = vmatprep.subr.bf16.mxu0 %v553_v17  ;;  %v587_v26 = vpack.c.bf16 %v73_v23, %v69_v21  ;;  %v78_v28 = vld [vmem:[#allocation5 + $0x98] sm:$0xff]  ;;  %v75_v30 = vld [vmem:[#allocation5 + $0x80] sm:$0xff] }
  0x2e   :  { %586 = vmatprep.subr.bf16.mxu1 %v585_v18  ;;  %v557_v27 = vpack.c.bf16 %v80_v25, %v76_v24  ;;  %v82_v29 = vld [vmem:[#allocation5 + $0xb8] sm:$0xff]  ;;  %v79_v32 = vld [vmem:[#allocation5 + $0xa0] sm:$0xff]  ;;  %v77_v33 = vld [vmem:[#allocation5 + $0x90] sm:$0xff] }
  0x2f   :  { %v589_v31 = vpack.c.bf16 %v82_v29, %v78_v28  ;;  %v81_v34 = vld [vmem:[#allocation5 + $0xb0] sm:$0xff]  ;;  %v559_v35 = vpack.c.bf16 %v79_v32, %v75_v30  ;;  %v84_v36 = vld [vmem:[#allocation5 + $0xc8] sm:$0xff]  ;;  %v86_v38 = vld [vmem:[#allocation5 + $0xd8] sm:$0xff] }
  0x30   :  { %556 = vmatpush1.bf16.msra.mxu0 %v555_v22  ;;  %v88_v37 = vld [vmem:[#allocation5 + $0xe8] sm:$0xff]  ;;  %v591_v39 = vpack.c.bf16 %v81_v34, %v77_v33  ;;  %v90_v41 = vld [vmem:[#allocation5 + $0xf8] sm:$0xff]  ;;  %v83_v42 = vld [vmem:[#allocation5 + $0xc0] sm:$0xff] }
  0x31   :  { %588 = vmatpush1.bf16.msra.mxu1 %v587_v26  ;;  %558 = vmatprep.subr.bf16.mxu0 %v557_v27  ;;  %v561_v40 = vpack.c.bf16 %v88_v37, %v84_v36  ;;  %v87_v43 = vld [vmem:[#allocation5 + $0xe0] sm:$0xff]  ;;  %v593_v44 = vpack.c.bf16 %v90_v41, %v86_v38  ;;  %v85_v45 = vld [vmem:[#allocation5 + $0xd0] sm:$0xff]  ;;  %v92_v47 = vld [vmem:[#allocation5 + $0x108] sm:$0xff] }
  0x32   :  { %590 = vmatprep.subr.bf16.mxu1 %v589_v31  ;;  %v89_v46 = vld [vmem:[#allocation5 + $0xf0] sm:$0xff]  ;;  %v96_v48 = vld [vmem:[#allocation5 + $0x128] sm:$0xff]  ;;  %v94_v49 = vld [vmem:[#allocation5 + $0x118] sm:$0xff]  ;;  %v563_v51 = vpack.c.bf16 %v87_v43, %v83_v42 }
  0x33   :  { %v98_v50 = vld [vmem:[#allocation5 + $0x138] sm:$0xff]  ;;  %v595_v52 = vpack.c.bf16 %v89_v46, %v85_v45  ;;  %v565_v53 = vpack.c.bf16 %v96_v48, %v92_v47  ;;  %v91_v54 = vld [vmem:[#allocation5 + $0x100] sm:$0xff]  ;;  %v93_v56 = vld [vmem:[#allocation5 + $0x110] sm:$0xff] }
  0x34   :  { %560 = vmatpush1.bf16.msra.mxu0 %v559_v35  ;;  %v95_v55 = vld [vmem:[#allocation5 + $0x120] sm:$0xff]  ;;  %v597_v57 = vpack.c.bf16 %v98_v50, %v94_v49  ;;  %v97_v58 = vld [vmem:[#allocation5 + $0x130] sm:$0xff]  ;;  %v100_v59 = vld [vmem:[#allocation5 + $0x148] sm:$0xff]  ;;  %v125_v50 = vlaneseq }
  0x35   :  { %592 = vmatpush1.bf16.msra.mxu1 %v591_v39  ;;  %562 = vmatprep.subr.bf16.mxu0 %v561_v40  ;;  %v104_v60 = vld [vmem:[#allocation5 + $0x168] sm:$0xff]  ;;  %v102_v61 = vld [vmem:[#allocation5 + $0x158] sm:$0xff]  ;;  %v567_v63 = vpack.c.bf16 %v95_v55, %v91_v54  ;;  %v599_v1 = vpack.c.bf16 %v97_v58, %v93_v56  ;;  %v99_v3 = vld [vmem:[#allocation5 + $0x140] sm:$0xff] }
  0x36   :  { %594 = vmatprep.subr.bf16.mxu1 %v593_v44  ;;  %v106_v62 = vld [vmem:[#allocation5 + $0x178] sm:$0xff]  ;;  %v569_v2 = vpack.c.bf16 %v104_v60, %v100_v59  ;;  %v103_v4 = vld [vmem:[#allocation5 + $0x160] sm:$0xff]  ;;  %v101_v5 = vld [vmem:[#allocation5 + $0x150] sm:$0xff] }
  0x37   :  { %v601_v6 = vpack.c.bf16 %v106_v62, %v102_v61  ;;  %v105_v7 = vld [vmem:[#allocation5 + $0x170] sm:$0xff]  ;;  %v108_v8 = vld [vmem:[#allocation5 + $0x188] sm:$0xff]  ;;  %v110_v10 = vld [vmem:[#allocation5 + $0x198] sm:$0xff]  ;;  %v571_v12 = vpack.c.bf16 %v103_v4, %v99_v3 }
  0x38   :  { %564 = vmatpush1.bf16.msra.mxu0 %v563_v51  ;;  %v112_v9 = vld [vmem:[#allocation5 + $0x1a8] sm:$0xff]  ;;  %v114_v11 = vld [vmem:[#allocation5 + $0x1b8] sm:$0xff]  ;;  %v603_v13 = vpack.c.bf16 %v105_v7, %v101_v5  ;;  %v107_v15 = vld [vmem:[#allocation5 + $0x180] sm:$0xff]  ;;  %v126_v51 = vshrl.u32 %v125_v50, 7 }
  0x39   :  { %596 = vmatpush1.bf16.msra.mxu1 %v595_v52  ;;  %566 = vmatprep.subr.bf16.mxu0 %v565_v53  ;;  %v573_v14 = vpack.c.bf16 %v112_v9, %v108_v8  ;;  %v111_v16 = vld [vmem:[#allocation5 + $0x1a0] sm:$0xff]  ;;  %v109_v17 = vld [vmem:[#allocation5 + $0x190] sm:$0xff]  ;;  %v605_v18 = vpack.c.bf16 %v114_v11, %v110_v10  ;;  %v116_v20 = vld [vmem:[#allocation5 + $0x1c8] sm:$0xff] }
  0x3a   :  { %598 = vmatprep.subr.bf16.mxu1 %v597_v57  ;;  %v113_v19 = vld [vmem:[#allocation5 + $0x1b0] sm:$0xff]  ;;  %v120_v21 = vld [vmem:[#allocation5 + $0x1e8] sm:$0xff]  ;;  %v118_v22 = vld [vmem:[#allocation5 + $0x1d8] sm:$0xff]  ;;  %v575_v24 = vpack.c.bf16 %v111_v16, %v107_v15  ;;  %v127_v52 = vsub.s32 0, %v126_v51  ;;  %v135_v54 = vsub.s32 2, %v126_v51  ;;  %v131_v55 = vsub.s32 1, %v126_v51 }
  0x3b   :  { %v122_v23 = vld [vmem:[#allocation5 + $0x1f8] sm:$0xff]  ;;  %v607_v25 = vpack.c.bf16 %v113_v19, %v109_v17  ;;  %v577_v26 = vpack.c.bf16 %v120_v21, %v116_v20  ;;  %v115_v27 = vld [vmem:[#allocation5 + $0x1c0] sm:$0xff]  ;;  %v117_v30 = vld [vmem:[#allocation5 + $0x1d0] sm:$0xff]  ;;  %v139_v56 = vsub.s32 3, %v126_v51 }
  0x3c   :  { %568 = vmatpush1.bf16.msra.mxu0 %v567_v63  ;;  %v119_v28 = vld [vmem:[#allocation5 + $0x1e0] sm:$0xff]  ;;  %v609_v29 = vpack.c.bf16 %v122_v23, %v118_v22  ;;  %v121_v31 = vld [vmem:[#allocation5 + $0x1f0] sm:$0xff]  ;;  %v44_v35 = vld [vmem:[#allocation2 + $0x8] sm:$0xff] }
  0x3d   :  { %600 = vmatpush1.bf16.msra.mxu1 %v599_v1  ;;  %570 = vmatprep.subr.bf16.mxu0 %v569_v2  ;;  %v579_v32 = vpack.c.bf16 %v119_v28, %v115_v27  ;;  %v611_v33 = vpack.c.bf16 %v121_v31, %v117_v30  ;;  %v43_v34 = vld [vmem:[#allocation2] sm:$0xff]  ;;  %v45_v36 = vld [vmem:[#allocation2 + $0x10] sm:$0xff]  ;;  %v46_v37 = vld [vmem:[#allocation2 + $0x18] sm:$0xff] }
  0x3e   :  { %602 = vmatprep.subr.bf16.mxu1 %v601_v6  ;;  %v47_v38 = vld [vmem:[#allocation2 + $0x20] sm:$0xff]  ;;  %v48_v39 = vld [vmem:[#allocation2 + $0x28] sm:$0xff]  ;;  %v49_v40 = vld [vmem:[#allocation2 + $0x30] sm:$0xff] }
  0x3f   :  { %v50_v41 = vld [vmem:[#allocation2 + $0x38] sm:$0xff]  ;;  %v51_v42 = vld [vmem:[#allocation2 + $0x40] sm:$0xff]  ;;  %v52_v43 = vld [vmem:[#allocation2 + $0x48] sm:$0xff] }
  0x40   :  { %572 = vmatpush1.bf16.msra.mxu0 %v571_v12  ;;  %v53_v44 = vld [vmem:[#allocation2 + $0x50] sm:$0xff]  ;;  %v54_v45 = vld [vmem:[#allocation2 + $0x58] sm:$0xff]  ;;  %v55_v46 = vld [vmem:[#allocation2 + $0x60] sm:$0xff] }
  0x41   :  { %604 = vmatpush1.bf16.msra.mxu1 %v603_v13  ;;  %574 = vmatprep.subr.bf16.mxu0 %v573_v14  ;;  %v56_v47 = vld [vmem:[#allocation2 + $0x68] sm:$0xff]  ;;  %v57_v48 = vld [vmem:[#allocation2 + $0x70] sm:$0xff]  ;;  %v58_v49 = vld [vmem:[#allocation2 + $0x78] sm:$0xff] }
  0x42   :  { %606 = vmatprep.subr.bf16.mxu1 %v605_v18  ;;  %v123_v53 = vld [vmem:[%s872_s2] sm:$0xf]  ;;  %s700_s2 = smov [#allocation7]  }
  0x43   :  { %v783_v57 = vrot.slane %v123_v53, %v127_v52  ;;  %v785_v58 = vrot.slane %v123_v53, %v135_v54  ;;  %v787_v59 = vrot.slane %v123_v53, %v131_v55  ;;  %v789_v60 = vrot.slane %v123_v53, %v139_v56  ;;  %s536_s13 = sshll.u32 %s700_s2, 4  ;;  %s537_s13 = int_to_ptr.vmem [resolvable:$true] %s536_s13 }
  0x44   :  { %576 = vmatpush1.bf16.msra.mxu0 %v575_v24  ;;  %s665_s14 = scalar_lea.vmem %s537_s13, 8192  ;;  %p670_p3 = scmp.lt.s32.totalorder %s537_s13, %s537_s13 }
  0x45   :  { %608 = vmatpush1.bf16.msra.mxu1 %v607_v25  ;;  %578 = vmatprep.subr.bf16.mxu0 %v577_v26  ;;  %p666_p2 = scmp.ne.s32.totalorder %s537_s13, %s665_s14  ;;  %p671_p4 = scmp.lt.s32.totalorder %s665_s14, %s665_s14 }
  0x46   :  { %610 = vmatprep.subr.bf16.mxu1 %v609_v29 }
  0x47   :  { %p672_p5 = por %p671_p4, %p670_p3 }
  0x48   :  { %580 = vmatpush1.bf16.msra.mxu0 %v579_v32 }
  0x49   :  { %612 = vmatpush1.bf16.msra.mxu1 %v611_v33  ;;  %p673_p6 = pnand %p672_p5, %p666_p2 }
  0x4b   :  { %210 = vmatmul.mubr.f32.vlgmr.msra.gmra.mrb[0].mxu0 %v43_v34 }
  0x4c   :  { %371 = vmatmul.mubr.f32.vlgmr.msra.gmra.mrb[0].mxu1 %v43_v34  ;;  %215 = vmatprep.mubr.f32.mxu0 %v699_v0 }
  0x4d   :  { %376 = vmatprep.mubr.f32.mxu1 %v699_v0 }
  0x4f   :  { %216 = vmatmul.mubr.f32.gmra.mrb[2].mxu0 %v44_v35 }
  0x50   :  { %377 = vmatmul.mubr.f32.gmra.mrb[2].mxu1 %v44_v35  ;;  %221 = vmatprep.mubr.f32.mxu0 %v699_v0 }
  0x51   :  { %382 = vmatprep.mubr.f32.mxu1 %v699_v0 }
  0x53   :  { %222 = vmatmul.mubr.f32.gmra.mrb[4].mxu0 %v45_v36 }
  0x54   :  { %383 = vmatmul.mubr.f32.gmra.mrb[4].mxu1 %v45_v36  ;;  %227 = vmatprep.mubr.f32.mxu0 %v699_v0 }
  0x55   :  { %388 = vmatprep.mubr.f32.mxu1 %v699_v0 }
  0x57   :  { %228 = vmatmul.mubr.f32.gmra.mrb[6].mxu0 %v46_v37 }
  0x58   :  { %389 = vmatmul.mubr.f32.gmra.mrb[6].mxu1 %v46_v37  ;;  %233 = vmatprep.mubr.f32.mxu0 %v699_v0 }
  0x59   :  { %394 = vmatprep.mubr.f32.mxu1 %v699_v0 }
  0x5b   :  { %234 = vmatmul.mubr.f32.gmra.mrb[8].mxu0 %v47_v38 }
  0x5c   :  { %395 = vmatmul.mubr.f32.gmra.mrb[8].mxu1 %v47_v38  ;;  %239 = vmatprep.mubr.f32.mxu0 %v699_v0 }
  0x5d   :  { %400 = vmatprep.mubr.f32.mxu1 %v699_v0 }
  0x5f   :  { %240 = vmatmul.mubr.f32.gmra.mrb[10].mxu0 %v48_v39 }
  0x60   :  { %401 = vmatmul.mubr.f32.gmra.mrb[10].mxu1 %v48_v39  ;;  %245 = vmatprep.mubr.f32.mxu0 %v699_v0 }
  0x61   :  { %406 = vmatprep.mubr.f32.mxu1 %v699_v0 }
  0x63   :  { %246 = vmatmul.mubr.f32.gmra.mrb[12].mxu0 %v49_v40 }
  0x64   :  { %407 = vmatmul.mubr.f32.gmra.mrb[12].mxu1 %v49_v40  ;;  %251 = vmatprep.mubr.f32.mxu0 %v699_v0 }
  0x65   :  { %412 = vmatprep.mubr.f32.mxu1 %v699_v0 }
  0x67   :  { %252 = vmatmul.mubr.f32.gmra.mrb[14].mxu0 %v50_v41 }
  0x68   :  { %413 = vmatmul.mubr.f32.gmra.mrb[14].mxu1 %v50_v41  ;;  %257 = vmatprep.mubr.f32.mxu0 %v699_v0 }
  0x69   :  { %418 = vmatprep.mubr.f32.mxu1 %v699_v0 }
  0x6b   :  { %258 = vmatmul.mubr.f32.gmra.mrb[16].mxu0 %v51_v42 }
  0x6c   :  { %419 = vmatmul.mubr.f32.gmra.mrb[16].mxu1 %v51_v42  ;;  %263 = vmatprep.mubr.f32.mxu0 %v699_v0 }
  0x6d   :  { %424 = vmatprep.mubr.f32.mxu1 %v699_v0 }
  0x6f   :  { %264 = vmatmul.mubr.f32.gmra.mrb[18].mxu0 %v52_v43 }
  0x70   :  { %425 = vmatmul.mubr.f32.gmra.mrb[18].mxu1 %v52_v43  ;;  %269 = vmatprep.mubr.f32.mxu0 %v699_v0 }
  0x71   :  { %430 = vmatprep.mubr.f32.mxu1 %v699_v0 }
  0x73   :  { %270 = vmatmul.mubr.f32.gmra.mrb[20].mxu0 %v53_v44 }
  0x74   :  { %431 = vmatmul.mubr.f32.gmra.mrb[20].mxu1 %v53_v44  ;;  %275 = vmatprep.mubr.f32.mxu0 %v699_v0 }
  0x75   :  { %436 = vmatprep.mubr.f32.mxu1 %v699_v0 }
  0x77   :  { %276 = vmatmul.mubr.f32.gmra.mrb[22].mxu0 %v54_v45 }
  0x78   :  { %437 = vmatmul.mubr.f32.gmra.mrb[22].mxu1 %v54_v45  ;;  %281 = vmatprep.mubr.f32.mxu0 %v699_v0 }
  0x79   :  { %442 = vmatprep.mubr.f32.mxu1 %v699_v0 }
  0x7b   :  { %282 = vmatmul.mubr.f32.gmra.mrb[24].mxu0 %v55_v46 }
  0x7c   :  { %443 = vmatmul.mubr.f32.gmra.mrb[24].mxu1 %v55_v46  ;;  %287 = vmatprep.mubr.f32.mxu0 %v699_v0 }
  0x7d   :  { %448 = vmatprep.mubr.f32.mxu1 %v699_v0 }
  0x7f   :  { %288 = vmatmul.mubr.f32.gmra.mrb[26].mxu0 %v56_v47 }
  0x80   :  { %449 = vmatmul.mubr.f32.gmra.mrb[26].mxu1 %v56_v47  ;;  %293 = vmatprep.mubr.f32.mxu0 %v699_v0 }
  0x81   :  { %454 = vmatprep.mubr.f32.mxu1 %v699_v0 }
  0x83   :  { %294 = vmatmul.mubr.f32.gmra.mrb[28].mxu0 %v57_v48 }
  0x84   :  { %455 = vmatmul.mubr.f32.gmra.mrb[28].mxu1 %v57_v48  ;;  %299 = vmatprep.mubr.f32.mxu0 %v699_v0 }
  0x85   :  { %460 = vmatprep.mubr.f32.mxu1 %v699_v0 }
  0x87   :  { %300 = vmatmul.mubr.f32.gmra.mrb[30].mxu0 %v58_v49 }
  0x88   :  { %461 = vmatmul.mubr.f32.gmra.mrb[30].mxu1 %v58_v49 }
 0x11e   :  { %v211_v0 = vpop.f32.mrb[0].mxu0 }
 0x11f   :  { %v212_v61 = vadd.f32 %v211_v0, %v783_v57  ;;  %v372_v62 = vpop.f32.mrb[0].mxu1  ;;  %v213_v63 = vpop.f32.mrb[1].mxu0 }
 0x120   :  { %v373_v1 = vadd.f32 %v372_v62, %v785_v58  ;;  %v214_v2 = vadd.f32 %v213_v63, %v787_v59  ;;  %v374_v3 = vpop.f32.mrb[1].mxu1 }
 0x121   :  { %467 = vst [vmem:[#allocation7] sm:$0xff] %v212_v61  ;;  %v375_v4 = vadd.f32 %v374_v3, %v789_v60 }
 0x122   :  { %469 = vst [vmem:[#allocation7 + $0x10] sm:$0xff] %v373_v1  ;;  %468 = vst [vmem:[#allocation7 + $0x8] sm:$0xff] %v214_v2  ;;  %v217_v5 = vpop.f32.mrb[2].mxu0 }
 0x123   :  { %470 = vst [vmem:[#allocation7 + $0x18] sm:$0xff] %v375_v4  ;;  %v218_v6 = vadd.f32 %v217_v5, %v783_v57  ;;  %v378_v7 = vpop.f32.mrb[2].mxu1  ;;  %v219_v8 = vpop.f32.mrb[3].mxu0 }
 0x124   :  { %v379_v9 = vadd.f32 %v378_v7, %v785_v58  ;;  %v220_v10 = vadd.f32 %v219_v8, %v787_v59  ;;  %v380_v11 = vpop.f32.mrb[3].mxu1 }
 0x125   :  { %471 = vst [vmem:[#allocation7 + $0x20] sm:$0xff] %v218_v6  ;;  %v381_v12 = vadd.f32 %v380_v11, %v789_v60 }
 0x126   :  { %473 = vst [vmem:[#allocation7 + $0x30] sm:$0xff] %v379_v9  ;;  %472 = vst [vmem:[#allocation7 + $0x28] sm:$0xff] %v220_v10  ;;  %v223_v13 = vpop.f32.mrb[4].mxu0 }
 0x127   :  { %474 = vst [vmem:[#allocation7 + $0x38] sm:$0xff] %v381_v12  ;;  %v224_v14 = vadd.f32 %v223_v13, %v783_v57  ;;  %v384_v15 = vpop.f32.mrb[4].mxu1  ;;  %v225_v16 = vpop.f32.mrb[5].mxu0 }
 0x128   :  { %v385_v17 = vadd.f32 %v384_v15, %v785_v58  ;;  %v226_v18 = vadd.f32 %v225_v16, %v787_v59  ;;  %v386_v19 = vpop.f32.mrb[5].mxu1 }
 0x129   :  { %475 = vst [vmem:[#allocation7 + $0x40] sm:$0xff] %v224_v14  ;;  %v387_v20 = vadd.f32 %v386_v19, %v789_v60 }
 0x12a   :  { %477 = vst [vmem:[#allocation7 + $0x50] sm:$0xff] %v385_v17  ;;  %476 = vst [vmem:[#allocation7 + $0x48] sm:$0xff] %v226_v18  ;;  %v229_v21 = vpop.f32.mrb[6].mxu0 }
 0x12b   :  { %478 = vst [vmem:[#allocation7 + $0x58] sm:$0xff] %v387_v20  ;;  %v230_v22 = vadd.f32 %v229_v21, %v783_v57  ;;  %v390_v23 = vpop.f32.mrb[6].mxu1  ;;  %v231_v24 = vpop.f32.mrb[7].mxu0 }
 0x12c   :  { %v391_v25 = vadd.f32 %v390_v23, %v785_v58  ;;  %v232_v26 = vadd.f32 %v231_v24, %v787_v59  ;;  %v392_v27 = vpop.f32.mrb[7].mxu1 }
 0x12d   :  { %479 = vst [vmem:[#allocation7 + $0x60] sm:$0xff] %v230_v22  ;;  %v393_v28 = vadd.f32 %v392_v27, %v789_v60 }
 0x12e   :  { %481 = vst [vmem:[#allocation7 + $0x70] sm:$0xff] %v391_v25  ;;  %480 = vst [vmem:[#allocation7 + $0x68] sm:$0xff] %v232_v26  ;;  %v235_v29 = vpop.f32.mrb[8].mxu0 }
 0x12f   :  { %482 = vst [vmem:[#allocation7 + $0x78] sm:$0xff] %v393_v28  ;;  %v236_v30 = vadd.f32 %v235_v29, %v783_v57  ;;  %v396_v31 = vpop.f32.mrb[8].mxu1  ;;  %v237_v32 = vpop.f32.mrb[9].mxu0 }
 0x130   :  { %v397_v33 = vadd.f32 %v396_v31, %v785_v58  ;;  %v238_v34 = vadd.f32 %v237_v32, %v787_v59  ;;  %v398_v35 = vpop.f32.mrb[9].mxu1 }
 0x131   :  { %483 = vst [vmem:[#allocation7 + $0x80] sm:$0xff] %v236_v30  ;;  %v399_v36 = vadd.f32 %v398_v35, %v789_v60 }
 0x132   :  { %485 = vst [vmem:[#allocation7 + $0x90] sm:$0xff] %v397_v33  ;;  %484 = vst [vmem:[#allocation7 + $0x88] sm:$0xff] %v238_v34  ;;  %v241_v37 = vpop.f32.mrb[10].mxu0 }
 0x133   :  { %486 = vst [vmem:[#allocation7 + $0x98] sm:$0xff] %v399_v36  ;;  %v242_v38 = vadd.f32 %v241_v37, %v783_v57  ;;  %v402_v39 = vpop.f32.mrb[10].mxu1  ;;  %v243_v40 = vpop.f32.mrb[11].mxu0 }
 0x134   :  { %v403_v41 = vadd.f32 %v402_v39, %v785_v58  ;;  %v244_v42 = vadd.f32 %v243_v40, %v787_v59  ;;  %v404_v43 = vpop.f32.mrb[11].mxu1 }
 0x135   :  { %487 = vst [vmem:[#allocation7 + $0xa0] sm:$0xff] %v242_v38  ;;  %v405_v44 = vadd.f32 %v404_v43, %v789_v60 }
 0x136   :  { %489 = vst [vmem:[#allocation7 + $0xb0] sm:$0xff] %v403_v41  ;;  %488 = vst [vmem:[#allocation7 + $0xa8] sm:$0xff] %v244_v42  ;;  %v247_v45 = vpop.f32.mrb[12].mxu0 }
 0x137   :  { %490 = vst [vmem:[#allocation7 + $0xb8] sm:$0xff] %v405_v44  ;;  %v248_v46 = vadd.f32 %v247_v45, %v783_v57  ;;  %v408_v47 = vpop.f32.mrb[12].mxu1  ;;  %v249_v48 = vpop.f32.mrb[13].mxu0 }
 0x138   :  { %v409_v49 = vadd.f32 %v408_v47, %v785_v58  ;;  %v250_v50 = vadd.f32 %v249_v48, %v787_v59  ;;  %v410_v51 = vpop.f32.mrb[13].mxu1 }
 0x139   :  { %491 = vst [vmem:[#allocation7 + $0xc0] sm:$0xff] %v248_v46  ;;  %v411_v52 = vadd.f32 %v410_v51, %v789_v60 }
 0x13a   :  { %493 = vst [vmem:[#allocation7 + $0xd0] sm:$0xff] %v409_v49  ;;  %492 = vst [vmem:[#allocation7 + $0xc8] sm:$0xff] %v250_v50  ;;  %v253_v53 = vpop.f32.mrb[14].mxu0 }
 0x13b   :  { %494 = vst [vmem:[#allocation7 + $0xd8] sm:$0xff] %v411_v52  ;;  %v254_v54 = vadd.f32 %v253_v53, %v783_v57  ;;  %v414_v55 = vpop.f32.mrb[14].mxu1  ;;  %v255_v56 = vpop.f32.mrb[15].mxu0 }
 0x13c   :  { %v415_v0 = vadd.f32 %v414_v55, %v785_v58  ;;  %v256_v61 = vadd.f32 %v255_v56, %v787_v59  ;;  %v416_v62 = vpop.f32.mrb[15].mxu1 }
 0x13d   :  { %495 = vst [vmem:[#allocation7 + $0xe0] sm:$0xff] %v254_v54  ;;  %v417_v63 = vadd.f32 %v416_v62, %v789_v60 }
 0x13e   :  { %497 = vst [vmem:[#allocation7 + $0xf0] sm:$0xff] %v415_v0  ;;  %496 = vst [vmem:[#allocation7 + $0xe8] sm:$0xff] %v256_v61  ;;  %v259_v1 = vpop.f32.mrb[16].mxu0 }
 0x13f   :  { %498 = vst [vmem:[#allocation7 + $0xf8] sm:$0xff] %v417_v63  ;;  %v260_v2 = vadd.f32 %v259_v1, %v783_v57  ;;  %v420_v3 = vpop.f32.mrb[16].mxu1  ;;  %v261_v4 = vpop.f32.mrb[17].mxu0 }
 0x140   :  { %v421_v5 = vadd.f32 %v420_v3, %v785_v58  ;;  %v262_v6 = vadd.f32 %v261_v4, %v787_v59  ;;  %v422_v7 = vpop.f32.mrb[17].mxu1 }
 0x141   :  { %499 = vst [vmem:[#allocation7 + $0x100] sm:$0xff] %v260_v2  ;;  %v423_v8 = vadd.f32 %v422_v7, %v789_v60 }
 0x142   :  { %501 = vst [vmem:[#allocation7 + $0x110] sm:$0xff] %v421_v5  ;;  %500 = vst [vmem:[#allocation7 + $0x108] sm:$0xff] %v262_v6  ;;  %v265_v9 = vpop.f32.mrb[18].mxu0 }
 0x143   :  { %502 = vst [vmem:[#allocation7 + $0x118] sm:$0xff] %v423_v8  ;;  %v266_v10 = vadd.f32 %v265_v9, %v783_v57  ;;  %v426_v11 = vpop.f32.mrb[18].mxu1  ;;  %v267_v12 = vpop.f32.mrb[19].mxu0 }
 0x144   :  { %v427_v13 = vadd.f32 %v426_v11, %v785_v58  ;;  %v268_v14 = vadd.f32 %v267_v12, %v787_v59  ;;  %v428_v15 = vpop.f32.mrb[19].mxu1 }
 0x145   :  { %503 = vst [vmem:[#allocation7 + $0x120] sm:$0xff] %v266_v10  ;;  %v429_v16 = vadd.f32 %v428_v15, %v789_v60 }
 0x146   :  { %505 = vst [vmem:[#allocation7 + $0x130] sm:$0xff] %v427_v13  ;;  %504 = vst [vmem:[#allocation7 + $0x128] sm:$0xff] %v268_v14  ;;  %v271_v17 = vpop.f32.mrb[20].mxu0 }
 0x147   :  { %506 = vst [vmem:[#allocation7 + $0x138] sm:$0xff] %v429_v16  ;;  %v272_v18 = vadd.f32 %v271_v17, %v783_v57  ;;  %v432_v19 = vpop.f32.mrb[20].mxu1  ;;  %v273_v20 = vpop.f32.mrb[21].mxu0 }
 0x148   :  { %v433_v21 = vadd.f32 %v432_v19, %v785_v58  ;;  %v274_v22 = vadd.f32 %v273_v20, %v787_v59  ;;  %v434_v23 = vpop.f32.mrb[21].mxu1 }
 0x149   :  { %507 = vst [vmem:[#allocation7 + $0x140] sm:$0xff] %v272_v18  ;;  %v435_v24 = vadd.f32 %v434_v23, %v789_v60 }
 0x14a   :  { %509 = vst [vmem:[#allocation7 + $0x150] sm:$0xff] %v433_v21  ;;  %508 = vst [vmem:[#allocation7 + $0x148] sm:$0xff] %v274_v22  ;;  %v277_v25 = vpop.f32.mrb[22].mxu0 }
 0x14b   :  { %510 = vst [vmem:[#allocation7 + $0x158] sm:$0xff] %v435_v24  ;;  %v278_v26 = vadd.f32 %v277_v25, %v783_v57  ;;  %v438_v27 = vpop.f32.mrb[22].mxu1  ;;  %v279_v28 = vpop.f32.mrb[23].mxu0 }
 0x14c   :  { %v439_v29 = vadd.f32 %v438_v27, %v785_v58  ;;  %v280_v30 = vadd.f32 %v279_v28, %v787_v59  ;;  %v440_v31 = vpop.f32.mrb[23].mxu1 }
 0x14d   :  { %511 = vst [vmem:[#allocation7 + $0x160] sm:$0xff] %v278_v26  ;;  %v441_v32 = vadd.f32 %v440_v31, %v789_v60 }
 0x14e   :  { %513 = vst [vmem:[#allocation7 + $0x170] sm:$0xff] %v439_v29  ;;  %512 = vst [vmem:[#allocation7 + $0x168] sm:$0xff] %v280_v30  ;;  %v283_v33 = vpop.f32.mrb[24].mxu0 }
 0x14f   :  { %514 = vst [vmem:[#allocation7 + $0x178] sm:$0xff] %v441_v32  ;;  %v284_v34 = vadd.f32 %v283_v33, %v783_v57  ;;  %v444_v35 = vpop.f32.mrb[24].mxu1  ;;  %v285_v36 = vpop.f32.mrb[25].mxu0 }
 0x150   :  { %v445_v37 = vadd.f32 %v444_v35, %v785_v58  ;;  %v286_v38 = vadd.f32 %v285_v36, %v787_v59  ;;  %v446_v39 = vpop.f32.mrb[25].mxu1 }
 0x151   :  { %515 = vst [vmem:[#allocation7 + $0x180] sm:$0xff] %v284_v34  ;;  %v447_v40 = vadd.f32 %v446_v39, %v789_v60 }
 0x152   :  { %517 = vst [vmem:[#allocation7 + $0x190] sm:$0xff] %v445_v37  ;;  %516 = vst [vmem:[#allocation7 + $0x188] sm:$0xff] %v286_v38  ;;  %v289_v41 = vpop.f32.mrb[26].mxu0 }
 0x153   :  { %518 = vst [vmem:[#allocation7 + $0x198] sm:$0xff] %v447_v40  ;;  %v290_v42 = vadd.f32 %v289_v41, %v783_v57  ;;  %v450_v43 = vpop.f32.mrb[26].mxu1  ;;  %v291_v44 = vpop.f32.mrb[27].mxu0 }
 0x154   :  { %v451_v45 = vadd.f32 %v450_v43, %v785_v58  ;;  %v292_v46 = vadd.f32 %v291_v44, %v787_v59  ;;  %v452_v47 = vpop.f32.mrb[27].mxu1 }
 0x155   :  { %519 = vst [vmem:[#allocation7 + $0x1a0] sm:$0xff] %v290_v42  ;;  %v453_v48 = vadd.f32 %v452_v47, %v789_v60 }
 0x156   :  { %521 = vst [vmem:[#allocation7 + $0x1b0] sm:$0xff] %v451_v45  ;;  %520 = vst [vmem:[#allocation7 + $0x1a8] sm:$0xff] %v292_v46  ;;  %v295_v49 = vpop.f32.mrb[28].mxu0 }
 0x157   :  { %522 = vst [vmem:[#allocation7 + $0x1b8] sm:$0xff] %v453_v48  ;;  %v296_v50 = vadd.f32 %v295_v49, %v783_v57  ;;  %v456_v51 = vpop.f32.mrb[28].mxu1  ;;  %v297_v52 = vpop.f32.mrb[29].mxu0 }
 0x158   :  { %v457_v53 = vadd.f32 %v456_v51, %v785_v58  ;;  %v298_v54 = vadd.f32 %v297_v52, %v787_v59  ;;  %v458_v55 = vpop.f32.mrb[29].mxu1 }
 0x159   :  { %523 = vst [vmem:[#allocation7 + $0x1c0] sm:$0xff] %v296_v50  ;;  %v459_v56 = vadd.f32 %v458_v55, %v789_v60 }
 0x15a   :  { %525 = vst [vmem:[#allocation7 + $0x1d0] sm:$0xff] %v457_v53  ;;  %524 = vst [vmem:[#allocation7 + $0x1c8] sm:$0xff] %v298_v54  ;;  %v301_v0 = vpop.f32.mrb[30].mxu0 }
 0x15b   :  { %526 = vst [vmem:[#allocation7 + $0x1d8] sm:$0xff] %v459_v56  ;;  %v302_v61 = vadd.f32 %v301_v0, %v783_v57  ;;  %v462_v62 = vpop.f32.mrb[30].mxu1  ;;  %v303_v63 = vpop.f32.mrb[31].mxu0 }
 0x15c   :  { %v463_v1 = vadd.f32 %v462_v62, %v785_v58  ;;  %v304_v2 = vadd.f32 %v303_v63, %v787_v59  ;;  %v464_v3 = vpop.f32.mrb[31].mxu1 }
 0x15d   :  { %527 = vst [vmem:[#allocation7 + $0x1e0] sm:$0xff] %v302_v61  ;;  %v465_v4 = vadd.f32 %v464_v3, %v789_v60 }
 0x15e   :  { %529 = vst [vmem:[#allocation7 + $0x1f0] sm:$0xff] %v463_v1  ;;  %528 = vst [vmem:[#allocation7 + $0x1e8] sm:$0xff] %v304_v2 }
 0x15f   :  { %530 = vst [vmem:[#allocation7 + $0x1f8] sm:$0xff] %v465_v4 }
 0x160   :  { %676 = shalt.err (!%p673_p6)
}
 0x161   :  { %s677_s17 = scalar_lea.hbm %s873_s3, 8192 }
 0x162   :  { %p678_p7 = scmp.ne.s32.totalorder %s873_s3, %s677_s17  ;;  %p681_p8 = scmp.lt.u32.totalorder %s677_s17, %s873_s3 }
 0x164   :  { %p683_p9 = pnand %p681_p8, %p678_p7 }
 0x166   :  { %686 = shalt.err (!%p683_p9)
}
 0x167   :  { %542 = dma.vmem_to_hbm [thread:$0]  %s537_s13, 8192, %s873_s3, [#allocation4], %s697_s0, %s697_s0, %s698_s9  }
 0x168   :  { %691 = dma.done.wait [#allocation4], 8192  }
 0x169   :  { %692 = vsyncadd [#allocation4], 4294959104 }
 0x16a   :  { %546 = vsyncpa [#allocation3], 1 }
 0x16b   :  { %547 = vsyncpa [#allocation6], 1 }
 0x16c   :  { %548 = vsyncpa [#allocation4], 1 }

</bundles_post_ra>
